<compile_context>
chip_gen: v6e
topology: v6e:2x2x1
jax: 0.10.0
libtpu: 0.0.40
codegen_flags: <defaults>
</compile_context>

<pallas_src>
import jax
import jax.numpy as jnp
from jax.experimental import pallas as pl
from jax.experimental.pallas import tpu as pltpu


# ----------------------------------------------------------------------------
# Pass 1: G = relu((A @ X) @ W1_all + b1_all) @ W2_fold     (tiled over A rows
# and the k reduction; W2_fold applied in the epilogue so pass 2 only streams
# OUT_C lanes)
# ----------------------------------------------------------------------------
def _gcn_pass1_kernel(a_ref, x_ref, w1_ref, b1_ref, w2f_ref, g_ref, acc_ref):
    k = pl.program_id(1)

    @pl.when(k == 0)
    def _():
        acc_ref[...] = jnp.zeros_like(acc_ref)

    # Aggregate raw features first (reassociated): acc += A[i,k] @ X[k]
    acc_ref[...] += jnp.dot(a_ref[...], x_ref[...],
                            preferred_element_type=jnp.float32)

    @pl.when(k == pl.num_programs(1) - 1)
    def _():
        ax = acc_ref[...]                                          # [tm, IN_P] f32
        h = jnp.dot(ax.astype(jnp.bfloat16), w1_ref[...],
                    preferred_element_type=jnp.float32)            # [tm, 3HID_P]
        h = jnp.maximum(h + b1_ref[...], 0.0)                      # bias+ReLU f32
        g = jnp.dot(h.astype(jnp.bfloat16), w2f_ref[...],
                    preferred_element_type=jnp.float32)            # [tm, OUT_P]
        g_ref[...] = g.astype(g_ref.dtype)


# ----------------------------------------------------------------------------
# Pass 2: out = A @ G + b_fold     (tiled over A rows and the k reduction)
# ----------------------------------------------------------------------------
def _gcn_pass2_kernel(a_ref, g_ref, bf_ref, o_ref, acc_ref):
    k = pl.program_id(1)

    @pl.when(k == 0)
    def _():
        acc_ref[...] = jnp.zeros_like(acc_ref)

    acc_ref[...] += jnp.dot(a_ref[...], g_ref[...],
                            preferred_element_type=jnp.float32)

    @pl.when(k == pl.num_programs(1) - 1)
    def _():
        o_ref[...] = (acc_ref[...] + bf_ref[...]).astype(o_ref.dtype)


# ----------------------------------------------------------------------------
# Wrapper: two pallas_calls, row axis parallel, k reduction axis last
# ----------------------------------------------------------------------------
def mixgnn_forward(packed, x_pad, a_pad, n_nodes, out_c, *, tm=128, tk=128):
    npad = a_pad.shape[0]
    in_pad = x_pad.shape[1]
    hid3_pad = packed["w1"].shape[1]
    out_pad = packed["w2f"].shape[1]
    grid = (npad // tm, npad // tk)
    cp = pltpu.CompilerParams(dimension_semantics=("parallel", "arbitrary"))

    # Pass 1 -> G (bf16, lane-padded) stays in its MXU-ready dtype for pass 2.
    g = pl.pallas_call(
        _gcn_pass1_kernel,
        out_shape=jax.ShapeDtypeStruct((npad, out_pad), jnp.bfloat16),
        grid=grid,
        in_specs=[
            pl.BlockSpec((tm, tk), lambda i, k: (i, k)),                # A
            pl.BlockSpec((tk, in_pad), lambda i, k: (k, 0)),            # X
            pl.BlockSpec((in_pad, hid3_pad), lambda i, k: (0, 0)),      # W1_all
            pl.BlockSpec((1, hid3_pad), lambda i, k: (0, 0)),           # b1_all
            pl.BlockSpec((hid3_pad, out_pad), lambda i, k: (0, 0)),     # W2_fold
        ],
        out_specs=pl.BlockSpec((tm, out_pad), lambda i, k: (i, 0)),
        scratch_shapes=[pltpu.VMEM((tm, in_pad), jnp.float32)],
        compiler_params=cp,
    )(a_pad, x_pad, packed["w1"], packed["b1"], packed["w2f"])

    # Pass 2 -> padded output, pad sliced off below.
    out_full = pl.pallas_call(
        _gcn_pass2_kernel,
        out_shape=jax.ShapeDtypeStruct((npad, out_pad), jnp.float32),
        grid=grid,
        in_specs=[
            pl.BlockSpec((tm, tk), lambda i, k: (i, k)),                # A
            pl.BlockSpec((tk, out_pad), lambda i, k: (k, 0)),           # G
            pl.BlockSpec((1, out_pad), lambda i, k: (0, 0)),            # b_fold
        ],
        out_specs=pl.BlockSpec((tm, out_pad), lambda i, k: (i, 0)),
        scratch_shapes=[pltpu.VMEM((tm, out_pad), jnp.float32)],
        compiler_params=cp,
    )(a_pad, g, packed["bf"])

    return out_full[:n_nodes, :out_c]


# ----------------------------------------------------------------------------
# Plain-JAX glue
# ----------------------------------------------------------------------------
def _round_up(x, m):
    return ((x + m - 1) // m) * m


def _pad2d(a, rows, cols):
    return jnp.pad(a, ((0, rows - a.shape[0]), (0, cols - a.shape[1])))


def build_norm_adj(edge_index, num_nodes):
    """Dense GCN-normalized adjacency: D^{-1/2} (A + I) D^{-1/2}."""
    # TODO(synk): duplicate edges are collapsed here; PyG's gcn_norm counts
    # multiplicities, so normalization can differ slightly on multigraphs.
    src, dst = edge_index[0], edge_index[1]
    a = jnp.zeros((num_nodes, num_nodes), jnp.float32)
    a = a.at[dst, src].set(1.0)                                   # j -> i
    a = jnp.maximum(a, jnp.eye(num_nodes, dtype=jnp.float32))     # self loops
    deg = a.sum(axis=1)
    d_inv_sqrt = jnp.where(deg > 0, 1.0 / jnp.sqrt(deg), 0.0)
    return d_inv_sqrt[:, None] * a * d_inv_sqrt[None, :]


def glorot(key, shape):
    fan_in, fan_out = shape
    limit = jnp.sqrt(6.0 / (fan_in + fan_out))
    return jax.random.uniform(key, shape, jnp.float32, -limit, limit)


def pack_params(params, in_pad, hid3_pad, out_pad):
    """Pack the 3 sub-GNNs' weights wide / block-diag, fold the fusing Linear
    into layer 2, and zero-pad every lane dim to a multiple of 128."""
    subs = params["subgnns"]
    hid = subs[0]["w1"].shape[1]
    out_c = subs[0]["w2"].shape[1]
    lin_w_t = params["lin_w_t"]                                   # [3*out, out]

    # Layer 1: weights side by side on the lane axis.
    w1 = jnp.concatenate([s["w1"] for s in subs], axis=1)         # [IN, 3*HID]
    b1 = jnp.concatenate([s["b1"] for s in subs], axis=0).reshape(1, -1)

    # Layer 2 folded with the fusing Linear (all in f32, then cast):
    #   W2_fold[s*hid:(s+1)*hid, :] = W2_s @ W_lin.T[s*out:(s+1)*out, :]
    w2f = jnp.concatenate(
        [subs[s]["w2"] @ lin_w_t[s * out_c:(s + 1) * out_c, :] for s in range(3)],
        axis=0)                                                   # [3*HID, OUT]
    b2_cat = jnp.concatenate([s["b2"] for s in subs], axis=0)     # [3*OUT]
    b_fold = (b2_cat @ lin_w_t + params["lin_b"]).reshape(1, -1)  # [1, OUT]

    return {
        "w1": _pad2d(w1, in_pad, hid3_pad).astype(jnp.bfloat16),
        "b1": _pad2d(b1, 1, hid3_pad).astype(jnp.float32),
        "w2f": _pad2d(w2f, hid3_pad, out_pad).astype(jnp.bfloat16),
        "bf": _pad2d(b_fold, 1, out_pad).astype(jnp.float32),
    }


def mixgnn_reference(params, x, a_hat):
    """Pure-JAX f32 reference (original, unfolded math)."""
    outs = []
    for sub in params["subgnns"]:
        h = jnp.maximum(a_hat @ (x @ sub["w1"]) + sub["b1"], 0.0)
        o = a_hat @ (h @ sub["w2"]) + sub["b2"]
        outs.append(o)
    cat = jnp.concatenate(outs, axis=-1)
    return cat @ params["lin_w_t"] + params["lin_b"]


# ----------------------------------------------------------------------------
# Main
# ----------------------------------------------------------------------------
if __name__ == "__main__":
    N = 16          # number of nodes
    E = 40          # number of edges
    IN_C = 8        # in_channels
    HID = 32        # hidden_channels
    OUT_C = 16      # out_channels
    NUM_SUB = 3     # het_mode='mix' -> 3 sub-GNNs
    TM = TK = 128   # tile sizes (see header TODO for per-generation sizing)

    key = jax.random.PRNGKey(0)
    k_x, k_e, k_p = jax.random.split(key, 3)

    # Inputs
    x = jax.random.normal(k_x, (N, IN_C), dtype=jnp.float32)
    edge_index = jax.random.randint(k_e, (2, E), 0, N, dtype=jnp.int32)
    a_hat = build_norm_adj(edge_index, N)

    # Parameters (small non-zero biases to exercise the bias adds).
    keys = jax.random.split(k_p, NUM_SUB * 4 + 2)
    subgnns = []
    for s in range(NUM_SUB):
        subgnns.append({
            "w1": glorot(keys[4 * s + 0], (IN_C, HID)),
            "b1": 0.1 * jax.random.normal(keys[4 * s + 1], (HID,), jnp.float32),
            "w2": glorot(keys[4 * s + 2], (HID, OUT_C)),
            "b2": 0.1 * jax.random.normal(keys[4 * s + 3], (OUT_C,), jnp.float32),
        })
    # nn.Linear(out*3, out): store weight already transposed -> [3*out, out]
    lin_w_t = glorot(keys[-2], (3 * OUT_C, OUT_C))
    lin_b = 0.1 * jax.random.normal(keys[-1], (OUT_C,), jnp.float32)
    params = {"subgnns": subgnns, "lin_w_t": lin_w_t, "lin_b": lin_b}

    # One-time padding / bf16 conversion of the big operands (NOT per call).
    NPAD = _round_up(N, max(TM, TK))
    IN_PAD = _round_up(IN_C, 128)
    HID3_PAD = _round_up(NUM_SUB * HID, 128)
    OUT_PAD = _round_up(OUT_C, 128)

    a_pad = _pad2d(a_hat, NPAD, NPAD).astype(jnp.bfloat16)
    x_pad = _pad2d(x, NPAD, IN_PAD).astype(jnp.bfloat16)
    packed = pack_params(params, IN_PAD, HID3_PAD, OUT_PAD)

    out = mixgnn_forward(packed, x_pad, a_pad, N, OUT_C, tm=TM, tk=TK)
    out = jax.block_until_ready(out)
    assert out.shape == (N, OUT_C), out.shape

    # Correctness vs. pure-JAX f32 reference (tolerance covers bf16 MXU inputs
    # and the W2 @ W_lin fold's changed rounding order).
    ref = mixgnn_reference(params, x, a_hat)
    max_err = float(jnp.max(jnp.abs(out - ref)))
    assert jnp.allclose(out, ref, rtol=5e-2, atol=5e-2), max_err

    print("KERNEL_OK")
</pallas_src>

<mosaic_0001>
module attributes {stable_mosaic.version = 11 : i64} {
  func.func @_gcn_pass1_kernel(%arg0: i32, %arg1: i32, %arg2: memref<128x128xbf16, #tpu.memory_space<vmem>>, %arg3: memref<128x128xbf16, #tpu.memory_space<vmem>>, %arg4: memref<128x128xbf16, #tpu.memory_space<vmem>>, %arg5: memref<1x128xf32, #tpu.memory_space<vmem>>, %arg6: memref<128x128xbf16, #tpu.memory_space<vmem>>, %arg7: memref<128x128xbf16, #tpu.memory_space<vmem>>, %arg8: memref<128x128xf32, #tpu.memory_space<vmem>>) attributes {dimension_semantics = [#tpu.dimension_semantics<parallel>, #tpu.dimension_semantics<arbitrary>], iteration_bounds = array<i64: 1, 1>, scalar_prefetch = 0 : i64, scratch_operands = 1 : i64, tpu.core_type = #tpu.core_type<tc>, window_params = [{transform_indices = @transform_0, window_bounds = array<i64: 128, 128>}, {transform_indices = @transform_1, window_bounds = array<i64: 128, 128>}, {pipeline_mode = #tpu.pipeline_mode<synchronous>, transform_indices = @transform_2, window_bounds = array<i64: 128, 128>}, {pipeline_mode = #tpu.pipeline_mode<synchronous>, transform_indices = @transform_3, window_bounds = array<i64: 1, 128>}, {pipeline_mode = #tpu.pipeline_mode<synchronous>, transform_indices = @transform_4, window_bounds = array<i64: 128, 128>}, {transform_indices = @transform_5, window_bounds = array<i64: 128, 128>}]} {
    %c0_i32 = arith.constant 0 : i32
    %0 = arith.cmpi eq, %arg1, %c0_i32 : i32
    %1 = arith.extui %0 : i1 to i32
    %c0_i32_0 = arith.constant 0 : i32
    %2 = arith.cmpi ne, %1, %c0_i32_0 : i32
    scf.if %2 {
      %cst_10 = arith.constant 0.000000e+00 : f32
      %12 = vector.broadcast %cst_10 : f32 to vector<128x128xf32>
      %c0_11 = arith.constant 0 : index
      %c0_12 = arith.constant 0 : index
      %13 = vector.load %arg8[%c0_11, %c0_12] : memref<128x128xf32, #tpu.memory_space<vmem>>, vector<128x128xf32>
      tpu.vector_store %arg8[%c0_11, %c0_12], %12 {strides = array<i32>} : memref<128x128xf32, #tpu.memory_space<vmem>>, vector<128x128xf32>,
    } else {
    }
    %c0 = arith.constant 0 : index
    %c0_1 = arith.constant 0 : index
    %3 = vector.load %arg8[%c0, %c0_1] : memref<128x128xf32, #tpu.memory_space<vmem>>, vector<128x128xf32>
    %c0_2 = arith.constant 0 : index
    %c0_3 = arith.constant 0 : index
    %4 = vector.load %arg2[%c0_2, %c0_3] : memref<128x128xbf16, #tpu.memory_space<vmem>>, vector<128x128xbf16>
    %c0_4 = arith.constant 0 : index
    %c0_5 = arith.constant 0 : index
    %5 = vector.load %arg3[%c0_4, %c0_5] : memref<128x128xbf16, #tpu.memory_space<vmem>>, vector<128x128xbf16>
    %cst = arith.constant dense<0.000000e+00> : vector<128x128xf32>
    %6 = tpu.matmul %4, %5, %cst {dimension_numbers = #tpu.dot_dimension_numbers<[1], [0], [0], [1], [0, 0, 1, 1], [], []>} : vector<128x128xbf16>, vector<128x128xbf16>, vector<128x128xf32> -> vector<128x128xf32>
    %7 = arith.addf %3, %6 : vector<128x128xf32>
    %c0_6 = arith.constant 0 : index
    %c0_7 = arith.constant 0 : index
    %8 = vector.load %arg8[%c0_6, %c0_7] : memref<128x128xf32, #tpu.memory_space<vmem>>, vector<128x128xf32>
    tpu.vector_store %arg8[%c0_6, %c0_7], %7 {strides = array<i32>} : memref<128x128xf32, #tpu.memory_space<vmem>>, vector<128x128xf32>,
    %c0_i32_8 = arith.constant 0 : i32
    %9 = arith.cmpi eq, %arg1, %c0_i32_8 : i32
    %10 = arith.extui %9 : i1 to i32
    %c0_i32_9 = arith.constant 0 : i32
    %11 = arith.cmpi ne, %10, %c0_i32_9 : i32
    scf.if %11 {
      %c0_10 = arith.constant 0 : index
      %c0_11 = arith.constant 0 : index
      %12 = vector.load %arg8[%c0_10, %c0_11] : memref<128x128xf32, #tpu.memory_space<vmem>>, vector<128x128xf32>
      %13 = arith.truncf %12 : vector<128x128xf32> to vector<128x128xbf16>
      %c0_12 = arith.constant 0 : index
      %c0_13 = arith.constant 0 : index
      %14 = vector.load %arg4[%c0_12, %c0_13] : memref<128x128xbf16, #tpu.memory_space<vmem>>, vector<128x128xbf16>
      %cst_14 = arith.constant dense<0.000000e+00> : vector<128x128xf32>
      %15 = tpu.matmul %13, %14, %cst_14 {dimension_numbers = #tpu.dot_dimension_numbers<[1], [0], [0], [1], [0, 0, 1, 1], [], []>} : vector<128x128xbf16>, vector<128x128xbf16>, vector<128x128xf32> -> vector<128x128xf32>
      %c0_15 = arith.constant 0 : index
      %c0_16 = arith.constant 0 : index
      %16 = vector.load %arg5[%c0_15, %c0_16] : memref<1x128xf32, #tpu.memory_space<vmem>>, vector<1x128xf32>
      %17 = vector.broadcast %16 : vector<1x128xf32> to vector<128x128xf32>
      %18 = arith.addf %15, %17 : vector<128x128xf32>
      %cst_17 = arith.constant 0.000000e+00 : f32
      %19 = vector.broadcast %cst_17 : f32 to vector<128x128xf32>
      %20 = arith.maximumf %18, %19 : vector<128x128xf32>
      %21 = arith.truncf %20 : vector<128x128xf32> to vector<128x128xbf16>
      %c0_18 = arith.constant 0 : index
      %c0_19 = arith.constant 0 : index
      %22 = vector.load %arg6[%c0_18, %c0_19] : memref<128x128xbf16, #tpu.memory_space<vmem>>, vector<128x128xbf16>
      %cst_20 = arith.constant dense<0.000000e+00> : vector<128x128xf32>
      %23 = tpu.matmul %21, %22, %cst_20 {dimension_numbers = #tpu.dot_dimension_numbers<[1], [0], [0], [1], [0, 0, 1, 1], [], []>} : vector<128x128xbf16>, vector<128x128xbf16>, vector<128x128xf32> -> vector<128x128xf32>
      %24 = arith.truncf %23 : vector<128x128xf32> to vector<128x128xbf16>
      %c0_21 = arith.constant 0 : index
      %c0_22 = arith.constant 0 : index
      %25 = vector.load %arg7[%c0_21, %c0_22] : memref<128x128xbf16, #tpu.memory_space<vmem>>, vector<128x128xbf16>
      tpu.vector_store %arg7[%c0_21, %c0_22], %24 {strides = array<i32>} : memref<128x128xbf16, #tpu.memory_space<vmem>>, vector<128x128xbf16>,
    } else {
    }
    return
  }
  func.func @transform_0(%arg0: i32, %arg1: i32) -> (i32, i32) {
    %c0_i32 = arith.constant 0 : i32
    return %arg0, %arg1 : i32, i32
  }
  func.func @transform_1(%arg0: i32, %arg1: i32) -> (i32, i32) {
    %c0_i32 = arith.constant 0 : i32
    %c0_i32_0 = arith.constant 0 : i32
    return %arg1, %c0_i32 : i32, i32
  }
  func.func @transform_2(%arg0: i32, %arg1: i32) -> (i32, i32) {
    %c0_i32 = arith.constant 0 : i32
    %c0_i32_0 = arith.constant 0 : i32
    %c0_i32_1 = arith.constant 0 : i32
    return %c0_i32, %c0_i32_0 : i32, i32
  }
  func.func @transform_3(%arg0: i32, %arg1: i32) -> (i32, i32) {
    %c0_i32 = arith.constant 0 : i32
    %c0_i32_0 = arith.constant 0 : i32
    %c0_i32_1 = arith.constant 0 : i32
    return %c0_i32, %c0_i32_0 : i32, i32
  }
  func.func @transform_4(%arg0: i32, %arg1: i32) -> (i32, i32) {
    %c0_i32 = arith.constant 0 : i32
    %c0_i32_0 = arith.constant 0 : i32
    %c0_i32_1 = arith.constant 0 : i32
    return %c0_i32, %c0_i32_0 : i32, i32
  }
  func.func @transform_5(%arg0: i32, %arg1: i32) -> (i32, i32) {
    %c0_i32 = arith.constant 0 : i32
    %c0_i32_0 = arith.constant 0 : i32
    return %arg0, %c0_i32 : i32, i32
  }
}

</mosaic_0001>

<bundles_post_ra>
// kernel: tpu_custom_call.1
= control target key start
LH: loop header
LB: loop body
LE: loop exit
PB: predicated region body
PF: predicated region fallthrough
CT: control target
= control target key end

     0   :  { %10 = vsyncpa [#allocation4], 0  ;;  %s1338_s0 = inlined_call_operand.hbm [shape: bf16[128,128], index: 0, kind: input, shape index: {}]   ;;  %s1339_s1 = inlined_call_operand.hbm [shape: bf16[128,128], index: 1, kind: input, shape index: {}]   ;;  %s1340_s2 = inlined_call_operand.hbm [shape: bf16[128,128], index: 2, kind: input, shape index: {}]   ;;  %s1341_s3 = inlined_call_operand.vmem [shape: f32[1,128], index: 3, kind: input, shape index: {}]   ;;  %s1342_s4 = inlined_call_operand.hbm [shape: bf16[128,128], index: 4, kind: input, shape index: {}]   ;;  %s1343_s5 = inlined_call_operand.hbm [shape: bf16[128,128], index: 5, kind: output, shape index: {}]  }
   0x1   :  { %11 = vsyncpa [#allocation7], 0 }
   0x2   :  { %12 = vsyncpa [#allocation10], 0 }
   0x3   :  { %13 = vsyncpa [#allocation5], 0  ;;  %s1268_s18 = smov [#allocation6]   ;;  %s1269_s20 = smov [#allocation3]  }
   0x4   :  { %s31_s19 = sshll.u32 %s1268_s18, 4  ;;  %s19_s21 = sshll.u32 %s1269_s20, 4  ;;  %s32_s19 = int_to_ptr.vmem [resolvable:$true] %s31_s19  ;;  %s20_s21 = int_to_ptr.vmem [resolvable:$true] %s19_s21 }
   0x5   :  { %s1168_s22 = scalar_lea.vmem %s32_s19, 1024  ;;  %p1173_p1 = scmp.lt.s32.totalorder %s32_s19, %s32_s19 }
   0x6   :  { %p1169_p0 = scmp.ne.s32.totalorder %s32_s19, %s1168_s22  ;;  %p1174_p2 = scmp.lt.s32.totalorder %s1168_s22, %s1168_s22 }
   0x8   :  { %p1175_p3 = por %p1174_p2, %p1173_p1 }
   0xa   :  { %p1176_p4 = pnand %p1175_p3, %p1169_p0 }
   0xc   :  { %1179 = shalt.err (!%p1176_p4)
}
   0xd   :  { %s1270_s23 = smov 64   ;;  %s1271_s24 = smov 4  }
   0xe   :  { %37 = dma.hbm_to_vmem [thread:$0]  %s1339_s1, 1024, %s32_s19, [#allocation7], %s1270_s23, %s1270_s23, %s1271_s24  }
   0xf   :  { %s1188_s27 = scalar_lea.vmem %s20_s21, 1024  ;;  %p1193_p6 = scmp.lt.s32.totalorder %s20_s21, %s20_s21 }
  0x10   :  { %p1189_p5 = scmp.ne.s32.totalorder %s20_s21, %s1188_s27  ;;  %p1194_p7 = scmp.lt.s32.totalorder %s1188_s27, %s1188_s27 }
  0x12   :  { %p1195_p8 = por %p1194_p7, %p1193_p6 }
  0x14   :  { %p1196_p9 = pnand %p1195_p8, %p1189_p5 }
  0x16   :  { %1199 = shalt.err (!%p1196_p9)
}
  0x17   :  { %25 = dma.hbm_to_vmem [thread:$0]  %s1338_s0, 1024, %s20_s21, [#allocation4], %s1270_s23, %s1270_s23, %s1271_s24  }
  0x18   :  { %s1272_s30 = smov [#allocation8]   ;;  %s1273_s7 = smov [#allocation9]  }
  0x19   :  { %s43_s6 = sshll.u32 %s1272_s30, 4  ;;  %s57_s8 = sshll.u32 %s1273_s7, 4  ;;  %s44_s6 = int_to_ptr.vmem [resolvable:$true] %s43_s6  ;;  %s58_s8 = int_to_ptr.vmem [resolvable:$true] %s57_s8 }
  0x1a   :  { %s1208_s1 = scalar_lea.vmem %s44_s6, 1024  ;;  %p1213_p11 = scmp.lt.s32.totalorder %s44_s6, %s44_s6 }
  0x1b   :  { %p1209_p10 = scmp.ne.s32.totalorder %s44_s6, %s1208_s1  ;;  %p1214_p12 = scmp.lt.s32.totalorder %s1208_s1, %s1208_s1 }
  0x1d   :  { %p1215_p13 = por %p1214_p12, %p1213_p11 }
  0x1f   :  { %p1216_p0 = pnand %p1215_p13, %p1209_p10 }
  0x21   :  { %1219 = shalt.err (!%p1216_p0)
}
  0x22   :  { %49 = dma.hbm_to_vmem [thread:$0]  %s1340_s2, 1024, %s44_s6, [#allocation7], %s1270_s23, %s1270_s23, %s1271_s24  }
  0x23   :  { %s1228_s0 = scalar_lea.vmem %s58_s8, 1024  ;;  %p1233_p2 = scmp.lt.s32.totalorder %s58_s8, %s58_s8 }
  0x24   :  { %p1229_p1 = scmp.ne.s32.totalorder %s58_s8, %s1228_s0  ;;  %p1234_p3 = scmp.lt.s32.totalorder %s1228_s0, %s1228_s0 }
  0x26   :  { %p1235_p4 = por %p1234_p3, %p1233_p2 }
  0x28   :  { %p1236_p5 = pnand %p1235_p4, %p1229_p1 }
  0x2a   :  { %1239 = shalt.err (!%p1236_p5)
}
  0x2b   :  { %63 = dma.hbm_to_vmem [thread:$0]  %s1342_s4, 1024, %s58_s8, [#allocation10], %s1270_s23, %s1270_s23, %s1271_s24  }
  0x2c   :  { %1260 = dma.done.wait [#allocation4], 1024  }
  0x2d   :  { %1261 = vsyncadd [#allocation4], 4294966272 }
  0x2e   :  { %1262 = dma.done.wait [#allocation7], 2048  }
  0x2f   :  { %1263 = vsyncadd [#allocation7], 4294965248 }
  0x30   :  { %1264 = dma.done.wait [#allocation10], 1024  }
  0x31   :  { %1265 = vsyncadd [#allocation10], 4294966272  ;;  %v1128_v0 = vld [vmem:[#allocation6 + $0x38] sm:$0xff]   ;;  %v1129_v1 = vld [vmem:[#allocation6 + $0x30] sm:$0xff]  }
  0x32   :  { %1009 = vmatprep.subr.bf16.mxu0 %v1128_v0  ;;  %v1130_v2 = vld [vmem:[#allocation6 + $0x28] sm:$0xff]   ;;  %v1131_v3 = vld [vmem:[#allocation6 + $0x20] sm:$0xff]   ;;  %v1132_v5 = vld [vmem:[#allocation6 + $0x18] sm:$0xff]  }
  0x33   :  { %1010 = vmatpush3.bf16.msra.mxu0 %v1128_v0  ;;  %v1136_v4 = vld [vmem:[#allocation3] sm:$0xff]   ;;  %v1133_v6 = vld [vmem:[#allocation6 + $0x10] sm:$0xff]   ;;  %v1144_v7 = vld [vmem:[#allocation8 + $0x38] sm:$0xff]  }
  0x34   :  { %1011 = vmatprep.subr.bf16.mxu0 %v1129_v1  ;;  %1025 = vmatprep.mubr.bf16.mxu0 %v1136_v4  ;;  %v1145_v8 = vld [vmem:[#allocation8 + $0x30] sm:$0xff]   ;;  %v1134_v9 = vld [vmem:[#allocation6 + $0x8] sm:$0xff]   ;;  %v1135_v11 = vld [vmem:[#allocation6] sm:$0xff]  }
  0x35   :  { %1041 = vmatprep.subr.bf16.mxu1 %v1144_v7  ;;  %v1146_v10 = vld [vmem:[#allocation8 + $0x28] sm:$0xff]   ;;  %v1147_v12 = vld [vmem:[#allocation8 + $0x20] sm:$0xff]   ;;  %v1148_v13 = vld [vmem:[#allocation8 + $0x18] sm:$0xff]  }
  0x36   :  { %1042 = vmatpush3.bf16.msra.mxu1 %v1144_v7  ;;  %v1137_v14 = vld [vmem:[#allocation3 + $0x8] sm:$0xff]   ;;  %v1138_v15 = vld [vmem:[#allocation3 + $0x10] sm:$0xff]   ;;  %v1139_v17 = vld [vmem:[#allocation3 + $0x18] sm:$0xff]  }
  0x37   :  { %1012 = vmatpush3.bf16.msra.mxu0 %v1129_v1  ;;  %1043 = vmatprep.subr.bf16.mxu1 %v1145_v8  ;;  %v1149_v16 = vld [vmem:[#allocation8 + $0x10] sm:$0xff]   ;;  %v1140_v18 = vld [vmem:[#allocation3 + $0x20] sm:$0xff]   ;;  %v1141_v19 = vld [vmem:[#allocation3 + $0x28] sm:$0xff]  }
  0x38   :  { %1013 = vmatprep.subr.bf16.mxu0 %v1130_v2  ;;  %v1142_v20 = vld [vmem:[#allocation3 + $0x30] sm:$0xff]   ;;  %v1143_v21 = vld [vmem:[#allocation3 + $0x38] sm:$0xff]   ;;  %v1150_v22 = vld [vmem:[#allocation8 + $0x8] sm:$0xff]  }
  0x39   :  { %v1151_v23 = vld [vmem:[#allocation8] sm:$0xff]   ;;  %v1152_v24 = vld [vmem:[#allocation9 + $0x38] sm:$0xff]   ;;  %v1153_v25 = vld [vmem:[#allocation9 + $0x30] sm:$0xff]  }
  0x3a   :  { %1044 = vmatpush3.bf16.msra.mxu1 %v1145_v8  ;;  %v1154_v26 = vld [vmem:[#allocation9 + $0x28] sm:$0xff]   ;;  %v1155_v27 = vld [vmem:[#allocation9 + $0x20] sm:$0xff]   ;;  %v1156_v28 = vld [vmem:[#allocation9 + $0x18] sm:$0xff]  }
  0x3b   :  { %1014 = vmatpush3.bf16.msra.mxu0 %v1130_v2  ;;  %1045 = vmatprep.subr.bf16.mxu1 %v1146_v10  ;;  %v1157_v53 = vld [vmem:[#allocation9 + $0x10] sm:$0xff]   ;;  %v1158_v54 = vld [vmem:[#allocation9 + $0x8] sm:$0xff]   ;;  %v1159_v55 = vld [vmem:[#allocation9] sm:$0xff]  }
  0x3c   :  { %1015 = vmatprep.subr.bf16.mxu0 %v1131_v3  ;;  %v865_v58 = vld [vmem:[%s1341_s3] ss:$0 sm:$0xff]  ;;  %s1274_s3 = smov [#allocation11]  }
  0x3d   :  { %s835_s13 = sshll.u32 %s1274_s3, 4  ;;  %s836_s13 = int_to_ptr.vmem [resolvable:$true] %s835_s13 }
  0x3e   :  { %1046 = vmatpush3.bf16.msra.mxu1 %v1146_v10  ;;  %s1240_s14 = scalar_lea.vmem %s836_s13, 1024  ;;  %p1245_p7 = scmp.lt.s32.totalorder %s836_s13, %s836_s13 }
  0x3f   :  { %1016 = vmatpush3.bf16.msra.mxu0 %v1131_v3  ;;  %1047 = vmatprep.subr.bf16.mxu1 %v1147_v12  ;;  %p1241_p6 = scmp.ne.s32.totalorder %s836_s13, %s1240_s14  ;;  %p1246_p8 = scmp.lt.s32.totalorder %s1240_s14, %s1240_s14 }
  0x40   :  { %1017 = vmatprep.subr.bf16.mxu0 %v1132_v5 }
  0x41   :  { %p1247_p9 = por %p1246_p8, %p1245_p7 }
  0x42   :  { %1048 = vmatpush3.bf16.msra.mxu1 %v1147_v12 }
  0x43   :  { %1018 = vmatpush3.bf16.msra.mxu0 %v1132_v5  ;;  %1049 = vmatprep.subr.bf16.mxu1 %v1148_v13  ;;  %p1248_p10 = pnand %p1247_p9, %p1241_p6 }
  0x44   :  { %1019 = vmatprep.subr.bf16.mxu0 %v1133_v6 }
  0x46   :  { %1050 = vmatpush3.bf16.msra.mxu1 %v1148_v13 }
  0x47   :  { %1020 = vmatpush3.bf16.msra.mxu0 %v1133_v6  ;;  %1051 = vmatprep.subr.bf16.mxu1 %v1149_v16 }
  0x48   :  { %1021 = vmatprep.subr.bf16.mxu0 %v1134_v9 }
  0x4a   :  { %1052 = vmatpush3.bf16.msra.mxu1 %v1149_v16 }
  0x4b   :  { %1022 = vmatpush3.bf16.msra.mxu0 %v1134_v9  ;;  %1053 = vmatprep.subr.bf16.mxu1 %v1150_v22 }
  0x4c   :  { %1023 = vmatprep.subr.bf16.mxu0 %v1135_v11 }
  0x4e   :  { %1054 = vmatpush3.bf16.msra.mxu1 %v1150_v22 }
  0x4f   :  { %1024 = vmatpush3.bf16.msra.mxu0 %v1135_v11  ;;  %1055 = vmatprep.subr.bf16.mxu1 %v1151_v23 }
  0x50   :  { %1073 = vmatprep.subr.bf16.mxu0 %v1152_v24 }
  0x52   :  { %1026 = vmatmul.mubr.bf16.vlgmr.msra.gmra.mxu0 %v1137_v14  ;;  %1056 = vmatpush3.bf16.msra.mxu1 %v1151_v23 }
  0x53   :  { %1029 = vmatprep.mubr.bf16.mxu0 %v1138_v15  ;;  %1105 = vmatprep.subr.bf16.mxu1 %v1152_v24 }
  0x54   :  { %1074 = vmatpush3.bf16.msra.mxu0 %v1152_v24 }
  0x55   :  { %1075 = vmatprep.subr.bf16.mxu0 %v1153_v25 }
  0x58   :  { %1076 = vmatpush3.bf16.msra.mxu0 %v1153_v25 }
  0x59   :  { %1077 = vmatprep.subr.bf16.mxu0 %v1154_v26 }
  0x5a   :  { %1030 = vmatmul.mubr.bf16.gmra.mxu0 %v1139_v17 }
  0x5b   :  { %1033 = vmatprep.mubr.bf16.mxu0 %v1140_v18 }
  0x5c   :  { %1078 = vmatpush3.bf16.msra.mxu0 %v1154_v26 }
  0x5d   :  { %1079 = vmatprep.subr.bf16.mxu0 %v1155_v27 }
  0x60   :  { %1080 = vmatpush3.bf16.msra.mxu0 %v1155_v27 }
  0x61   :  { %1081 = vmatprep.subr.bf16.mxu0 %v1156_v28 }
  0x62   :  { %1034 = vmatmul.mubr.bf16.gmra.mxu0 %v1141_v19 }
  0x63   :  { %1037 = vmatprep.mubr.bf16.mxu0 %v1142_v20 }
  0x64   :  { %1082 = vmatpush3.bf16.msra.mxu0 %v1156_v28 }
  0x65   :  { %1083 = vmatprep.subr.bf16.mxu0 %v1157_v53 }
  0x68   :  { %1084 = vmatpush3.bf16.msra.mxu0 %v1157_v53 }
  0x69   :  { %1085 = vmatprep.subr.bf16.mxu0 %v1158_v54 }
  0x6a   :  { %1038 = vmatmul.mubr.bf16.gmra.mxu0 %v1143_v21 }
  0x6c   :  { %1086 = vmatpush3.bf16.msra.mxu0 %v1158_v54 }
  0x6d   :  { %1087 = vmatprep.subr.bf16.mxu0 %v1159_v55 }
  0x70   :  { %1088 = vmatpush3.bf16.msra.mxu0 %v1159_v55 }
 0x112   :  { %v1027_v29 = vpop.f32.mrf.mxu0 }
 0x114   :  { %v275_v30 = vpop.f32.mrf.mxu0 }
 0x116   :  { %v1028_v31 = vpop.f32.mrf.mxu0 }
 0x117   :  { %v390_v34 = vpack.c.bf16 %v1028_v31, %v1027_v29 }
 0x118   :  { %v278_v32 = vpop.f32.mrf.mxu0 }
 0x119   :  { %v389_v33 = vpack.c.bf16 %v278_v32, %v275_v30 }
 0x11a   :  { %v1031_v35 = vpop.f32.mrf.mxu0 }
 0x11b   :  { %1057 = vmatprep.mubr.bf16.mxu1 %v389_v33 }
 0x11c   :  { %v291_v36 = vpop.f32.mrf.mxu0  ;;  %1058 = vmatmul.mubr.bf16.vlgmr.msra.gmra.mxu1 %v390_v34 }
 0x11d   :  { %1113 = vmatpush3.bf16.msra.mxu1 %v1152_v24 }
 0x11e   :  { %v1032_v37 = vpop.f32.mrf.mxu0  ;;  %1106 = vmatprep.subr.bf16.mxu1 %v1153_v25 }
 0x11f   :  { %v392_v40 = vpack.c.bf16 %v1032_v37, %v1031_v35 }
 0x120   :  { %v294_v38 = vpop.f32.mrf.mxu0 }
 0x121   :  { %v391_v39 = vpack.c.bf16 %v294_v38, %v291_v36  ;;  %1114 = vmatpush3.bf16.msra.mxu1 %v1153_v25 }
 0x122   :  { %v1035_v41 = vpop.f32.mrf.mxu0  ;;  %1107 = vmatprep.subr.bf16.mxu1 %v1154_v26 }
 0x123   :  { %1061 = vmatprep.mubr.bf16.mxu1 %v391_v39 }
 0x124   :  { %v307_v42 = vpop.f32.mrf.mxu0  ;;  %1062 = vmatmul.mubr.bf16.gmra.mxu1 %v392_v40 }
 0x125   :  { %1115 = vmatpush3.bf16.msra.mxu1 %v1154_v26 }
 0x126   :  { %v1036_v43 = vpop.f32.mrf.mxu0  ;;  %1108 = vmatprep.subr.bf16.mxu1 %v1155_v27 }
 0x127   :  { %v394_v46 = vpack.c.bf16 %v1036_v43, %v1035_v41 }
 0x128   :  { %v310_v44 = vpop.f32.mrf.mxu0 }
 0x129   :  { %v393_v45 = vpack.c.bf16 %v310_v44, %v307_v42  ;;  %1116 = vmatpush3.bf16.msra.mxu1 %v1155_v27 }
 0x12a   :  { %v1039_v47 = vpop.f32.mrf.mxu0  ;;  %1109 = vmatprep.subr.bf16.mxu1 %v1156_v28 }
 0x12b   :  { %1065 = vmatprep.mubr.bf16.mxu1 %v393_v45 }
 0x12c   :  { %v323_v48 = vpop.f32.mrf.mxu0  ;;  %1066 = vmatmul.mubr.bf16.gmra.mxu1 %v394_v46 }
 0x12d   :  { %1117 = vmatpush3.bf16.msra.mxu1 %v1156_v28 }
 0x12e   :  { %v1040_v49 = vpop.f32.mrf.mxu0  ;;  %1110 = vmatprep.subr.bf16.mxu1 %v1157_v53 }
 0x12f   :  { %v396_v52 = vpack.c.bf16 %v1040_v49, %v1039_v47 }
 0x130   :  { %v326_v50 = vpop.f32.mrf.mxu0 }
 0x131   :  { %v395_v51 = vpack.c.bf16 %v326_v50, %v323_v48  ;;  %1118 = vmatpush3.bf16.msra.mxu1 %v1157_v53 }
 0x132   :  { %1111 = vmatprep.subr.bf16.mxu1 %v1158_v54 }
 0x133   :  { %1069 = vmatprep.mubr.bf16.mxu1 %v395_v51 }
 0x134   :  { %1070 = vmatmul.mubr.bf16.gmra.mxu1 %v396_v52 }
 0x135   :  { %1119 = vmatpush3.bf16.msra.mxu1 %v1158_v54 }
 0x136   :  { %1112 = vmatprep.subr.bf16.mxu1 %v1159_v55 }
 0x139   :  { %1120 = vmatpush3.bf16.msra.mxu1 %v1159_v55 }
 0x1dc   :  { %v1059_v56 = vpop.f32.mrf.mxu1 }
 0x1dd   :  { %v511_v62 = vadd.f32 %v1059_v56, %v865_v58 }
 0x1de   :  { %v502_v57 = vpop.f32.mrf.mxu1 }
 0x1df   :  { %v503_v60 = vadd.f32 %v865_v58, %v502_v57  ;;  %v567_v5 = vmax.f32 %v511_v62, 0.0 }
 0x1e0   :  { %v1060_v59 = vpop.f32.mrf.mxu1 }
 0x1e1   :  { %v514_v61 = vadd.f32 %v1060_v59, %v865_v58  ;;  %v565_v3 = vmax.f32 %v503_v60, 0.0 }
 0x1e2   :  { %v505_v63 = vpop.f32.mrf.mxu1 }
 0x1e3   :  { %v506_v0 = vadd.f32 %v865_v58, %v505_v63  ;;  %v568_v1 = vmax.f32 %v514_v61, 0.0 }
 0x1e4   :  { %v1063_v2 = vpop.f32.mrf.mxu1 }
 0x1e5   :  { %v566_v4 = vmax.f32 %v506_v0, 0.0  ;;  %v582_v8 = vpack.c.bf16 %v568_v1, %v567_v5  ;;  %v527_v12 = vadd.f32 %v1063_v2, %v865_v58 }
 0x1e6   :  { %v518_v6 = vpop.f32.mrf.mxu1 }
 0x1e7   :  { %v581_v7 = vpack.c.bf16 %v566_v4, %v565_v3  ;;  %v519_v10 = vadd.f32 %v865_v58, %v518_v6  ;;  %v571_v19 = vmax.f32 %v527_v12, 0.0 }
 0x1e8   :  { %v1064_v9 = vpop.f32.mrf.mxu1 }
 0x1e9   :  { %v530_v11 = vadd.f32 %v1064_v9, %v865_v58  ;;  %1089 = vmatprep.mubr.bf16.mxu0 %v581_v7  ;;  %v569_v17 = vmax.f32 %v519_v10, 0.0 }
 0x1ea   :  { %v521_v13 = vpop.f32.mrf.mxu1  ;;  %1090 = vmatmul.mubr.bf16.vlgmr.msra.gmra.mxu0 %v582_v8 }
 0x1eb   :  { %v522_v14 = vadd.f32 %v865_v58, %v521_v13  ;;  %v572_v15 = vmax.f32 %v530_v11, 0.0 }
 0x1ec   :  { %v1067_v16 = vpop.f32.mrf.mxu1 }
 0x1ed   :  { %v570_v18 = vmax.f32 %v522_v14, 0.0  ;;  %v584_v22 = vpack.c.bf16 %v572_v15, %v571_v19  ;;  %v543_v26 = vadd.f32 %v1067_v16, %v865_v58 }
 0x1ee   :  { %v534_v20 = vpop.f32.mrf.mxu1 }
 0x1ef   :  { %v583_v21 = vpack.c.bf16 %v570_v18, %v569_v17  ;;  %v535_v24 = vadd.f32 %v865_v58, %v534_v20  ;;  %v575_v33 = vmax.f32 %v543_v26, 0.0 }
 0x1f0   :  { %v1068_v23 = vpop.f32.mrf.mxu1 }
 0x1f1   :  { %v546_v25 = vadd.f32 %v1068_v23, %v865_v58  ;;  %1093 = vmatprep.mubr.bf16.mxu0 %v583_v21  ;;  %v573_v31 = vmax.f32 %v535_v24, 0.0 }
 0x1f2   :  { %v537_v27 = vpop.f32.mrf.mxu1  ;;  %1094 = vmatmul.mubr.bf16.gmra.mxu0 %v584_v22 }
 0x1f3   :  { %v538_v28 = vadd.f32 %v865_v58, %v537_v27  ;;  %v576_v29 = vmax.f32 %v546_v25, 0.0 }
 0x1f4   :  { %v1071_v30 = vpop.f32.mrf.mxu1 }
 0x1f5   :  { %v574_v32 = vmax.f32 %v538_v28, 0.0  ;;  %v586_v36 = vpack.c.bf16 %v576_v29, %v575_v33  ;;  %v559_v40 = vadd.f32 %v1071_v30, %v865_v58 }
 0x1f6   :  { %v550_v34 = vpop.f32.mrf.mxu1 }
 0x1f7   :  { %v585_v35 = vpack.c.bf16 %v574_v32, %v573_v31  ;;  %v551_v38 = vadd.f32 %v865_v58, %v550_v34  ;;  %v579_v46 = vmax.f32 %v559_v40, 0.0 }
 0x1f8   :  { %v1072_v37 = vpop.f32.mrf.mxu1 }
 0x1f9   :  { %v562_v39 = vadd.f32 %v1072_v37, %v865_v58  ;;  %1097 = vmatprep.mubr.bf16.mxu1 %v585_v35  ;;  %v577_v44 = vmax.f32 %v551_v38, 0.0 }
 0x1fa   :  { %v553_v41 = vpop.f32.mrf.mxu1  ;;  %1098 = vmatmul.mubr.bf16.vlgmr.msra.gmra.mxu1 %v586_v36 }
 0x1fb   :  { %v554_v42 = vadd.f32 %v865_v58, %v553_v41  ;;  %v580_v43 = vmax.f32 %v562_v39, 0.0 }
 0x1fd   :  { %v578_v45 = vmax.f32 %v554_v42, 0.0  ;;  %v588_v48 = vpack.c.bf16 %v580_v43, %v579_v46 }
 0x1ff   :  { %v587_v47 = vpack.c.bf16 %v578_v45, %v577_v44 }
 0x201   :  { %1101 = vmatprep.mubr.bf16.mxu1 %v587_v47 }
 0x202   :  { %1102 = vmatmul.mubr.bf16.gmra.mxu1 %v588_v48 }
 0x2aa   :  { %v1091_v49 = vpop.f32.mrf.mxu0 }
 0x2ac   :  { %v687_v50 = vpop.f32.mrf.mxu0 }
 0x2ae   :  { %v1092_v51 = vpop.f32.mrf.mxu0 }
 0x2af   :  { %v922_v52 = vpack.c.bf16 %v1092_v51, %v1091_v49 }
 0x2b0   :  { %v690_v53 = vpop.f32.mrf.mxu0 }
 0x2b1   :  { %954 = vst [vmem:[#allocation11 + $0x8] sm:$0xff] %v922_v52   ;;  %v917_v54 = vpack.c.bf16 %v690_v53, %v687_v50 }
 0x2b2   :  { %v1095_v55 = vpop.f32.mrf.mxu0 }
 0x2b3   :  { %918 = vst [vmem:[#allocation11] sm:$0xff] %v917_v54  }
 0x2b4   :  { %v703_v56 = vpop.f32.mrf.mxu0 }
 0x2b6   :  { %v1096_v57 = vpop.f32.mrf.mxu0 }
 0x2b7   :  { %v932_v58 = vpack.c.bf16 %v1096_v57, %v1095_v55 }
 0x2b8   :  { %v706_v59 = vpop.f32.mrf.mxu0 }
 0x2b9   :  { %956 = vst [vmem:[#allocation11 + $0x18] sm:$0xff] %v932_v58   ;;  %v927_v60 = vpack.c.bf16 %v706_v59, %v703_v56 }
 0x2ba   :  { %v1099_v61 = vpop.f32.mrf.mxu1 }
 0x2bb   :  { %955 = vst [vmem:[#allocation11 + $0x10] sm:$0xff] %v927_v60  }
 0x2bc   :  { %v719_v62 = vpop.f32.mrf.mxu1 }
 0x2be   :  { %v1100_v63 = vpop.f32.mrf.mxu1 }
 0x2bf   :  { %v942_v0 = vpack.c.bf16 %v1100_v63, %v1099_v61 }
 0x2c0   :  { %v722_v1 = vpop.f32.mrf.mxu1 }
 0x2c1   :  { %958 = vst [vmem:[#allocation11 + $0x28] sm:$0xff] %v942_v0   ;;  %v937_v2 = vpack.c.bf16 %v722_v1, %v719_v62 }
 0x2c2   :  { %v1103_v3 = vpop.f32.mrf.mxu1 }
 0x2c3   :  { %957 = vst [vmem:[#allocation11 + $0x20] sm:$0xff] %v937_v2  }
 0x2c4   :  { %v735_v4 = vpop.f32.mrf.mxu1 }
 0x2c6   :  { %v1104_v5 = vpop.f32.mrf.mxu1 }
 0x2c7   :  { %v952_v6 = vpack.c.bf16 %v1104_v5, %v1103_v3 }
 0x2c8   :  { %v738_v7 = vpop.f32.mrf.mxu1 }
 0x2c9   :  { %960 = vst [vmem:[#allocation11 + $0x38] sm:$0xff] %v952_v6   ;;  %v947_v8 = vpack.c.bf16 %v738_v7, %v735_v4 }
 0x2cb   :  { %959 = vst [vmem:[#allocation11 + $0x30] sm:$0xff] %v947_v8  }
 0x2cc   :  { %1251 = shalt.err (!%p1248_p10)
}
 0x2cd   :  { %841 = dma.vmem_to_hbm [thread:$0]  %s836_s13, 1024, %s1343_s5, [#allocation5], %s1270_s23, %s1270_s23, %s1271_s24  }
 0x2ce   :  { %1266 = dma.done.wait [#allocation5], 1024  }
 0x2cf   :  { %1267 = vsyncadd [#allocation5], 4294966272 }
 0x2d0   :  { %845 = vsyncpa [#allocation4], 1 }
 0x2d1   :  { %846 = vsyncpa [#allocation7], 1 }
 0x2d2   :  { %847 = vsyncpa [#allocation10], 1 }
 0x2d3   :  { %848 = vsyncpa [#allocation5], 1 }

</bundles_post_ra>
